<compile_context>
chip_gen: v5e
topology: v5e:2x2
jax: 0.10.0
libtpu: 0.0.40
codegen_flags: <defaults>
</compile_context>

<pallas_src>
import functools

import jax
import jax.numpy as jnp
from jax import lax
from jax.experimental import pallas as pl
from jax.experimental.pallas import tpu as pltpu


# ----------------------------- helpers ------------------------------------


def _cdiv(a, b):
    return -(-a // b)


def _round_up(a, b):
    return _cdiv(a, b) * b


def _device_kind():
    try:
        return jax.devices()[0].device_kind.lower()
    except Exception:
        return ""


def _is_two_tensorcore_chip():
    # v7x has 2 TensorCores per chip; v5e/v6e have 1.  Detection failure only
    # affects the blocking policy, never correctness.
    kind = _device_kind()
    return ("v7" in kind) or ("7x" in kind)


def _vmem_capacity_bytes():
    try:
        return int(pltpu.get_tpu_info().vmem_capacity_bytes)
    except Exception:
        return 0


def _choose_blocking(rows, cols_p, itembytes, *, two_tc,
                     target_block_bytes=4 * 1024 * 1024):
    """Pick (rows_per_block, grid_steps, padded_row_count)."""
    row_bytes = cols_p * itembytes
    # Largest rb (multiple of 8) whose input block stays near the target.
    max_rb = max(8, (target_block_bytes // row_bytes) // 8 * 8)
    rows8 = _round_up(rows, 8)

    if rows8 <= max_rb:
        if two_tc and rows8 >= 16:
            # Split into exactly 2 blocks so both TensorCores get work.
            steps = 2
            rb = _round_up(_cdiv(rows8, 2), 8)
        else:
            # Single full-extent block (no sublane padding needed), grid=(1,).
            return rows, 1, rows
    else:
        rb = max_rb
        steps = _cdiv(rows8, rb)
        if two_tc and steps % 2 == 1:
            # Even step count => even split across the 2 TensorCores.
            steps += 1
            rb = _round_up(_cdiv(rows8, steps), 8)
    return rb, steps, rb * steps


# ------------------------------ kernel ------------------------------------


def _lcn_group_kernel(x_ref, w_ref, b_ref, o_ref, *, eps, cpg, hw_p, n_valid):
    # x_ref/o_ref: (rb, cpg*hw_p)  lane-dense rows, one row per (batch, group)
    # w_ref/b_ref: (rb, cpg)       per-row, per-channel affine params
    rb = x_ref.shape[0]

    # Pass 1: per-row sum and sum-of-squares, accumulated channel-chunk by
    # channel-chunk so only an (rb, hw_p) f32 temp is live at any time.
    s = jnp.zeros((rb, 1), jnp.float32)
    ss = jnp.zeros((rb, 1), jnp.float32)
    for j in range(cpg):
        lo = j * hw_p
        xj = x_ref[:, lo:lo + hw_p].astype(jnp.float32)
        s = s + jnp.sum(xj, axis=-1, keepdims=True)
        ss = ss + jnp.sum(xj * xj, axis=-1, keepdims=True)

    inv_n = 1.0 / n_valid
    inv_nm1 = 1.0 / max(n_valid - 1, 1)
    mean = s * inv_n
    # Clamp: the one-pass form can go slightly negative on near-constant rows.
    var = jnp.maximum(ss - s * mean, 0.0) * inv_nm1   # unbiased (torch default)
    inv_std = lax.rsqrt(var + eps)                    # EUP slot (free)

    w = w_ref[...].astype(jnp.float32)                # (rb, cpg)
    b = b_ref[...].astype(jnp.float32)

    # Pass 2: y = x*scale + shift per channel chunk.  Each chunk is re-read
    # from VMEM (cheap) instead of keeping a full-block f32 copy live; hw_p is
    # a multiple of 128, so every load/store below is aligned and unmasked.
    for j in range(cpg):
        lo = j * hw_p
        scale = inv_std * w[:, j:j + 1]               # (rb, 1)
        shift = b[:, j:j + 1] - mean * scale          # (rb, 1)
        xj = x_ref[:, lo:lo + hw_p].astype(jnp.float32)
        o_ref[:, lo:lo + hw_p] = (xj * scale + shift).astype(o_ref.dtype)


# ------------------------------ wrapper -----------------------------------


def local_context_norm(x, weight, bias, *, channels_per_group=2,
                       window_size=(227, 227), eps=1e-5):
    N, C, H, W = x.shape
    assert C % channels_per_group == 0
    G = C // channels_per_group
    cpg = channels_per_group
    hw = H * W

    if window_size[0] < H and window_size[1] < W:
        # TODO(synk): local-window branch (integral images + conv3d) not implemented.
        raise NotImplementedError("local window branch not implemented")

    rows = N * G
    itembytes = jnp.dtype(x.dtype).itemsize

    # Pad H*W up to a multiple of 128 so per-channel chunks are lane-aligned.
    # (No-op for the common case where H*W is already a multiple of 128; for
    # small feature maps the pad trades a bounded amount of extra HBM traffic
    # for fully unmasked, lane-dense loads/stores.)
    hw_p = _round_up(hw, 128)
    cols_p = cpg * hw_p

    x3 = x.reshape(rows, cpg, hw)
    if hw_p != hw:
        x3 = jnp.pad(x3, ((0, 0), (0, 0), (0, hw_p - hw)))
    x2 = x3.reshape(rows, cols_p)

    # Per-row, per-channel affine params (tiny: N*C elements each in HBM).
    w_rc = jnp.tile(jnp.reshape(weight, (G, cpg)), (N, 1))
    b_rc = jnp.tile(jnp.reshape(bias, (G, cpg)), (N, 1))

    # Generation-aware row blocking.
    two_tc = _is_two_tensorcore_chip()
    rb, steps, rows_padded = _choose_blocking(rows, cols_p, itembytes,
                                              two_tc=two_tc)
    if rows_padded != rows:
        pad_r = rows_padded - rows
        x2 = jnp.pad(x2, ((0, pad_r), (0, 0)))
        w_rc = jnp.pad(w_rc, ((0, pad_r), (0, 0)))
        b_rc = jnp.pad(b_rc, ((0, pad_r), (0, 0)))

    # Explicit VMEM budget: double-buffered in/out blocks + lane-padded
    # (rb, 128) weight/bias buffers + in-kernel f32 chunk temps + headroom.
    blk_io = rb * cols_p * itembytes
    blk_wb = rb * 128 * 4
    chunk_f32 = rb * hw_p * 4
    footprint = 4 * blk_io + 4 * blk_wb + 3 * chunk_f32 + (4 << 20)
    vmem_limit = max(footprint, 32 << 20)
    vmem_cap = _vmem_capacity_bytes()
    if vmem_cap:
        vmem_limit = min(vmem_limit, (vmem_cap * 7) // 8)
    vmem_limit = max(vmem_limit, footprint)

    kernel = functools.partial(_lcn_group_kernel, eps=eps, cpg=cpg,
                               hw_p=hw_p, n_valid=cpg * hw)

    out2 = pl.pallas_call(
        kernel,
        out_shape=jax.ShapeDtypeStruct((rows_padded, cols_p), x.dtype),
        grid_spec=pltpu.PrefetchScalarGridSpec(
            num_scalar_prefetch=0,
            grid=(steps,),
            in_specs=[
                pl.BlockSpec((rb, cols_p), lambda i: (i, 0)),
                pl.BlockSpec((rb, cpg), lambda i: (i, 0)),
                pl.BlockSpec((rb, cpg), lambda i: (i, 0)),
            ],
            out_specs=pl.BlockSpec((rb, cols_p), lambda i: (i, 0)),
        ),
        compiler_params=pltpu.CompilerParams(
            dimension_semantics=("parallel",),
            vmem_limit_bytes=int(vmem_limit)),
    )(x2, w_rc, b_rc)

    out2 = out2[:rows]
    if hw_p != hw:
        out = out2.reshape(rows, cpg, hw_p)[:, :, :hw].reshape(N, C, H, W)
    else:
        out = out2.reshape(N, C, H, W)
    return out


# ----------------------------- reference ----------------------------------


def _reference(x, weight, bias, channels_per_group=2, eps=1e-5):
    N, C, H, W = x.shape
    G = C // channels_per_group
    xg = x.reshape(N, G, -1).astype(jnp.float32)
    mean = xg.mean(-1, keepdims=True)
    var = xg.var(-1, keepdims=True, ddof=1)  # unbiased, like torch default
    xg = (xg - mean) / jnp.sqrt(var + eps)
    xn = xg.reshape(N, C, H, W)
    return xn * weight + bias


if __name__ == "__main__":
    key = jax.random.PRNGKey(0)
    kx, kw, kb = jax.random.split(key, 3)

    N, C, H, W = 2, 4, 16, 16
    channels_per_group = 2

    x = jax.random.normal(kx, (N, C, H, W), dtype=jnp.float32)
    # Non-trivial (but deterministic) affine params to exercise the folded
    # scale/shift path; module init would be ones/zeros.
    weight = 1.0 + 0.1 * jax.random.normal(kw, (1, C, 1, 1), dtype=jnp.float32)
    bias = 0.1 * jax.random.normal(kb, (1, C, 1, 1), dtype=jnp.float32)

    out = local_context_norm(x, weight, bias,
                             channels_per_group=channels_per_group,
                             window_size=(227, 227), eps=1e-5)
    out = jax.block_until_ready(out)

    ref = _reference(x, weight, bias, channels_per_group=channels_per_group)
    assert out.shape == (N, C, H, W)
    assert jnp.allclose(out, ref, atol=1e-5, rtol=1e-5), "mismatch vs reference"

    print("KERNEL_OK")
</pallas_src>

<mosaic_0001>
module attributes {stable_mosaic.version = 11 : i64} {
  func.func @_lcn_group_kernel(%arg0: i32, %arg1: memref<4x512xf32, #tpu.memory_space<vmem>>, %arg2: memref<4x2xf32, #tpu.memory_space<vmem>>, %arg3: memref<4x2xf32, #tpu.memory_space<vmem>>, %arg4: memref<4x512xf32, #tpu.memory_space<vmem>>) attributes {dimension_semantics = [#tpu.dimension_semantics<parallel>], iteration_bounds = array<i64: 1>, scalar_prefetch = 0 : i64, scratch_operands = 0 : i64, tpu.core_type = #tpu.core_type<tc>, window_params = [{transform_indices = @transform_0, window_bounds = array<i64: 4, 512>}, {transform_indices = @transform_1, window_bounds = array<i64: 4, 2>}, {transform_indices = @transform_2, window_bounds = array<i64: 4, 2>}, {transform_indices = @transform_3, window_bounds = array<i64: 4, 512>}]} {
    %cst = arith.constant 0.000000e+00 : f32
    %0 = vector.broadcast %cst : f32 to vector<4x1xf32>
    %cst_0 = arith.constant 0.000000e+00 : f32
    %1 = vector.broadcast %cst_0 : f32 to vector<4x1xf32>
    %c0 = arith.constant 0 : index
    %c0_1 = arith.constant 0 : index
    %2 = vector.load %arg1[%c0, %c0_1] : memref<4x512xf32, #tpu.memory_space<vmem>>, vector<4x256xf32>
    %cst_2 = arith.constant dense<0.000000e+00> : vector<4xf32>
    %3 = vector.multi_reduction <add>, %2, %cst_2 [1] : vector<4x256xf32> to vector<4xf32>
    %4 = vector.shape_cast %3 : vector<4xf32> to vector<4x1xf32>
    %5 = arith.addf %0, %4 : vector<4x1xf32>
    %6 = arith.mulf %2, %2 : vector<4x256xf32>
    %cst_3 = arith.constant dense<0.000000e+00> : vector<4xf32>
    %7 = vector.multi_reduction <add>, %6, %cst_3 [1] : vector<4x256xf32> to vector<4xf32>
    %8 = vector.shape_cast %7 : vector<4xf32> to vector<4x1xf32>
    %9 = arith.addf %1, %8 : vector<4x1xf32>
    %c0_4 = arith.constant 0 : index
    %c256 = arith.constant 256 : index
    %10 = vector.load %arg1[%c0_4, %c256] : memref<4x512xf32, #tpu.memory_space<vmem>>, vector<4x256xf32>
    %cst_5 = arith.constant dense<0.000000e+00> : vector<4xf32>
    %11 = vector.multi_reduction <add>, %10, %cst_5 [1] : vector<4x256xf32> to vector<4xf32>
    %12 = vector.shape_cast %11 : vector<4xf32> to vector<4x1xf32>
    %13 = arith.addf %5, %12 : vector<4x1xf32>
    %14 = arith.mulf %10, %10 : vector<4x256xf32>
    %cst_6 = arith.constant dense<0.000000e+00> : vector<4xf32>
    %15 = vector.multi_reduction <add>, %14, %cst_6 [1] : vector<4x256xf32> to vector<4xf32>
    %16 = vector.shape_cast %15 : vector<4xf32> to vector<4x1xf32>
    %17 = arith.addf %9, %16 : vector<4x1xf32>
    %cst_7 = arith.constant 0.001953125 : f32
    %18 = vector.broadcast %cst_7 : f32 to vector<4x1xf32>
    %19 = arith.mulf %13, %18 : vector<4x1xf32>
    %20 = arith.mulf %13, %19 : vector<4x1xf32>
    %21 = arith.subf %17, %20 : vector<4x1xf32>
    %cst_8 = arith.constant 0.000000e+00 : f32
    %22 = vector.broadcast %cst_8 : f32 to vector<4x1xf32>
    %23 = arith.maximumf %21, %22 : vector<4x1xf32>
    %cst_9 = arith.constant 0.00195694715 : f32
    %24 = vector.broadcast %cst_9 : f32 to vector<4x1xf32>
    %25 = arith.mulf %23, %24 : vector<4x1xf32>
    %cst_10 = arith.constant 9.99999974E-6 : f32
    %26 = vector.broadcast %cst_10 : f32 to vector<4x1xf32>
    %27 = arith.addf %25, %26 : vector<4x1xf32>
    %28 = math.rsqrt %27 : vector<4x1xf32>
    %c0_11 = arith.constant 0 : index
    %c0_12 = arith.constant 0 : index
    %29 = vector.load %arg2[%c0_11, %c0_12] : memref<4x2xf32, #tpu.memory_space<vmem>>, vector<4x2xf32>
    %c0_13 = arith.constant 0 : index
    %c0_14 = arith.constant 0 : index
    %30 = vector.load %arg3[%c0_13, %c0_14] : memref<4x2xf32, #tpu.memory_space<vmem>>, vector<4x2xf32>
    %31 = vector.extract_strided_slice %29 {offsets = [0, 0], sizes = [4, 1], strides = [1, 1]} : vector<4x2xf32> to vector<4x1xf32>
    %32 = arith.mulf %28, %31 : vector<4x1xf32>
    %33 = vector.extract_strided_slice %30 {offsets = [0, 0], sizes = [4, 1], strides = [1, 1]} : vector<4x2xf32> to vector<4x1xf32>
    %34 = arith.mulf %19, %32 : vector<4x1xf32>
    %35 = arith.subf %33, %34 : vector<4x1xf32>
    %c0_15 = arith.constant 0 : index
    %c0_16 = arith.constant 0 : index
    %36 = vector.load %arg1[%c0_15, %c0_16] : memref<4x512xf32, #tpu.memory_space<vmem>>, vector<4x256xf32>
    %37 = vector.broadcast %32 : vector<4x1xf32> to vector<4x256xf32>
    %38 = arith.mulf %36, %37 : vector<4x256xf32>
    %39 = vector.broadcast %35 : vector<4x1xf32> to vector<4x256xf32>
    %40 = arith.addf %38, %39 : vector<4x256xf32>
    %c0_17 = arith.constant 0 : index
    %c0_18 = arith.constant 0 : index
    %41 = vector.load %arg4[%c0_17, %c0_18] : memref<4x512xf32, #tpu.memory_space<vmem>>, vector<4x256xf32>
    tpu.vector_store %arg4[%c0_17, %c0_18], %40 {strides = array<i32>} : memref<4x512xf32, #tpu.memory_space<vmem>>, vector<4x256xf32>,
    %42 = vector.extract_strided_slice %29 {offsets = [0, 1], sizes = [4, 1], strides = [1, 1]} : vector<4x2xf32> to vector<4x1xf32>
    %43 = arith.mulf %28, %42 : vector<4x1xf32>
    %44 = vector.extract_strided_slice %30 {offsets = [0, 1], sizes = [4, 1], strides = [1, 1]} : vector<4x2xf32> to vector<4x1xf32>
    %45 = arith.mulf %19, %43 : vector<4x1xf32>
    %46 = arith.subf %44, %45 : vector<4x1xf32>
    %c0_19 = arith.constant 0 : index
    %c256_20 = arith.constant 256 : index
    %47 = vector.load %arg1[%c0_19, %c256_20] : memref<4x512xf32, #tpu.memory_space<vmem>>, vector<4x256xf32>
    %48 = vector.broadcast %43 : vector<4x1xf32> to vector<4x256xf32>
    %49 = arith.mulf %47, %48 : vector<4x256xf32>
    %50 = vector.broadcast %46 : vector<4x1xf32> to vector<4x256xf32>
    %51 = arith.addf %49, %50 : vector<4x256xf32>
    %c0_21 = arith.constant 0 : index
    %c256_22 = arith.constant 256 : index
    %52 = vector.load %arg4[%c0_21, %c256_22] : memref<4x512xf32, #tpu.memory_space<vmem>>, vector<4x256xf32>
    tpu.vector_store %arg4[%c0_21, %c256_22], %51 {strides = array<i32>} : memref<4x512xf32, #tpu.memory_space<vmem>>, vector<4x256xf32>,
    return
  }
  func.func @transform_0(%arg0: i32) -> (i32, i32) {
    %c0_i32 = arith.constant 0 : i32
    %c0_i32_0 = arith.constant 0 : i32
    return %arg0, %c0_i32 : i32, i32
  }
  func.func @transform_1(%arg0: i32) -> (i32, i32) {
    %c0_i32 = arith.constant 0 : i32
    %c0_i32_0 = arith.constant 0 : i32
    return %arg0, %c0_i32 : i32, i32
  }
  func.func @transform_2(%arg0: i32) -> (i32, i32) {
    %c0_i32 = arith.constant 0 : i32
    %c0_i32_0 = arith.constant 0 : i32
    return %arg0, %c0_i32 : i32, i32
  }
  func.func @transform_3(%arg0: i32) -> (i32, i32) {
    %c0_i32 = arith.constant 0 : i32
    %c0_i32_0 = arith.constant 0 : i32
    return %arg0, %c0_i32 : i32, i32
  }
}

</mosaic_0001>

<bundles_post_ra>
// kernel: tpu_custom_call.1
= control target key start
LH: loop header
LB: loop body
LE: loop exit
PB: predicated region body
PF: predicated region fallthrough
CT: control target
= control target key end

     0   :  { %8 = vsyncpa [#allocation3], 0  ;;  %s282_s0 = inlined_call_operand.hbm [shape: f32[4,512], index: 0, kind: input, shape index: {}]   ;;  %s283_s1 = inlined_call_operand.vmem [shape: f32[4,2], index: 1, kind: input, shape index: {}]   ;;  %s284_s2 = inlined_call_operand.vmem [shape: f32[4,2], index: 2, kind: input, shape index: {}]   ;;  %s285_s3 = inlined_call_operand.hbm [shape: f32[4,512], index: 3, kind: output, shape index: {}]  }
   0x1   :  { %9 = vsyncpa [#allocation4], 0  ;;  %s15_s14 = sshll.u32 %s282_s0, 4  ;;  %s225_s15 = smov [#allocation2]   ;;  %s16_s14 = int_to_ptr.hbm [resolvable:$true] %s15_s14 }
   0x2   :  { %s17_s16 = sshll.u32 %s225_s15, 4  ;;  %s18_s16 = int_to_ptr.vmem [resolvable:$true] %s17_s16 }
   0x3   :  { %20 = dma.hbm_to_vmem [thread:$0]  %s16_s14, 256, %s18_s16, [#allocation3]  }
   0x4   :  { %221 = dma.done.wait [#allocation3], 256  }
   0x5   :  { %222 = vsyncadd [#allocation3], 4294967040  ;;  %v253_v0 = vld [vmem:[#allocation2] sm:$0xff]  ;;  %vm36_vm0 = vcmask 1043456   ;;  %v260_v7 = vld [vmem:[#allocation2 + $0x8] sm:$0xff]  ;;  %v226_v26 = vmov 0  }
   0x6   :  { %31 = vst [vmem:[#allocation1] ss:$2 sm:$0xff] %v253_v0  ;;  %v43_v1 = vmul.f32 %v253_v0, %v253_v0  ;;  %v69_v13 = vmul.f32 %v260_v7, %v260_v7  ;;  %166 = vset.pattern.permute.xlu2 %v226_v26  ;;  %168 = vset.pattern.permute.xlu0 %v226_v26  ;;  %v227_v31 = vmov 1   ;;  %v98_v44 = vld [vmem:[%s283_s1] sm:$0xf]  ;;  %s229_s1 = smov [#allocation5]  }
   0x7   :  { %169 = vset.pattern.permute.xlu1 %v227_v31  ;;  %v99_v47 = vld [vmem:[%s284_s2] sm:$0xf]  ;;  %v228_v51 = vmov 839922192   ;;  %s149_s2 = sshll.u32 %s229_s1, 4  ;;  %s151_s22 = sshll.u32 %s285_s3, 4  ;;  %s150_s2 = int_to_ptr.vmem [resolvable:$true] %s149_s2  ;;  %s152_s22 = int_to_ptr.hbm [resolvable:$true] %s151_s22 }
   0x8   :  { %v108_v52 = vunpack.c.l.s4 %v228_v51 }
   0xa   :  { %v109_v53 = vunpack.c.0.s8 %v108_v52 }
   0xd   :  { %v32_v2 = vld.sshfl [vmem:[#allocation1] sm:$0xff pattern:$0x75316420]  ;;  %v33_v3 = vld.sshfl [vmem:[#allocation1 + $0x8] sm:$0xff pattern:$0x75316420] }
   0xe   :  { %v37_v4 = vsel %vm36_vm0, %v32_v2, 0.0  ;;  %v38_v5 = vsel %vm36_vm0, %v33_v3, 0.0  ;;  %45 = vst [vmem:[#allocation1] ss:$2 sm:$0xff] %v43_v1 }
   0xf   :  { %v39_v6 = vadd.f32 %v38_v5, %v37_v4 }
  0x11   :  { %40 = vadd.xlane.f32.xlu0 %v39_v6 }
  0x15   :  { %v46_v8 = vld.sshfl [vmem:[#allocation1] sm:$0xff pattern:$0x75316420]  ;;  %v47_v9 = vld.sshfl [vmem:[#allocation1 + $0x8] sm:$0xff pattern:$0x75316420] }
  0x16   :  { %v50_v10 = vsel %vm36_vm0, %v46_v8, 0.0  ;;  %v51_v11 = vsel %vm36_vm0, %v47_v9, 0.0  ;;  %58 = vst [vmem:[#allocation1] ss:$2 sm:$0xff] %v260_v7 }
  0x17   :  { %v52_v12 = vadd.f32 %v51_v11, %v50_v10 }
  0x19   :  { %53 = vadd.xlane.f32.xlu1 %v52_v12 }
  0x1d   :  { %v59_v14 = vld.sshfl [vmem:[#allocation1] sm:$0xff pattern:$0x75316420]  ;;  %v60_v15 = vld.sshfl [vmem:[#allocation1 + $0x8] sm:$0xff pattern:$0x75316420] }
  0x1e   :  { %v63_v16 = vsel %vm36_vm0, %v59_v14, 0.0  ;;  %v64_v17 = vsel %vm36_vm0, %v60_v15, 0.0  ;;  %71 = vst [vmem:[#allocation1] ss:$2 sm:$0xff] %v69_v13 }
  0x1f   :  { %v65_v18 = vadd.f32 %v64_v17, %v63_v16 }
  0x21   :  { %66 = vadd.xlane.f32.xlu0 %v65_v18 }
  0x25   :  { %v72_v19 = vld.sshfl [vmem:[#allocation1] sm:$0xff pattern:$0x75316420]  ;;  %v73_v20 = vld.sshfl [vmem:[#allocation1 + $0x8] sm:$0xff pattern:$0x75316420] }
  0x26   :  { %v76_v21 = vsel %vm36_vm0, %v72_v19, 0.0  ;;  %v77_v22 = vsel %vm36_vm0, %v73_v20, 0.0 }
  0x27   :  { %v78_v23 = vadd.f32 %v77_v22, %v76_v21 }
  0x29   :  { %79 = vadd.xlane.f32.xlu1 %v78_v23 }
  0x84   :  { %v41_v24 = vpop.xlane.xlu0 %40 }
  0x8c   :  { %v54_v25 = vpop.xlane.xlu1 %53 }
  0x94   :  { %v67_v27 = vpop.xlane.xlu0 %66 }
  0x95   :  { %v68_v28 = vadd.f32 %v67_v27, %v41_v24 }
  0x97   :  { %v82_v29 = vmul.f32 0.001953125, %v68_v28 }
  0x99   :  { %v83_v32 = vmul.f32 %v82_v29, %v68_v28 }
  0x9c   :  { %v80_v30 = vpop.xlane.xlu1 %79 }
  0x9d   :  { %v81_v33 = vadd.f32 %v80_v30, %v54_v25 }
  0x9f   :  { %v84_v34 = vsub.f32 %v81_v33, %v83_v32 }
  0xa1   :  { %v85_v35 = vmax.f32 %v84_v34, 0.0 }
  0xa3   :  { %v86_v36 = vmul.f32 0.0019569471, %v85_v35 }
  0xa5   :  { %v87_v37 = vadd.f32 1e-05, %v86_v36 }
  0xa7   :  { %171 = vrsqrt.f32 %v87_v37  ;;  %vm94_vm2 = vweird.f32 %v87_v37 }
  0xad   :  { %v172_v38 = vpop.eup %171 }
  0xae   :  { %v89_v39 = vmul.f32 %v172_v38, %v87_v37  ;;  %vm95_vm1 = vweird.f32 %v172_v38 }
  0xaf   :  { %vm96_vm3 = vmor %vm94_vm2, %vm95_vm1 }
  0xb0   :  { %v90_v40 = vmul.f32 %v172_v38, %v89_v39 }
  0xb2   :  { %v91_v41 = vmul.f32 0.5, %v90_v40 }
  0xb4   :  { %v92_v42 = vsub.f32 1.5, %v91_v41 }
  0xb6   :  { %v93_v43 = vmul.f32 %v172_v38, %v92_v42 }
  0xb8   :  { %v97_v45 = vsel %vm96_vm3, %v172_v38, %v93_v43 }
  0xb9   :  { %v100_v46 = vmul.f32 %v98_v44, %v97_v45 }
  0xbb   :  { %105 = vperm.xlu2 %166, %v100_v46   ;;  %v101_v48 = vmul.f32 %v100_v46, %v82_v29 }
  0xbd   :  { %v102_v49 = vsub.f32 %v99_v47, %v101_v48 }
  0xbf   :  { %135 = vperm.xlu1 %169, %v102_v49   ;;  %115 = vperm.xlu0 %168, %v102_v49  }
  0xc3   :  { %167 = vset.pattern.permute.xlu2 %v227_v31 }
  0xc4   :  { %126 = vperm.xlu2 %167, %v100_v46  }
  0xc7   :  { %170 = vset.pattern.permute.xlu0 %v227_v31 }
 0x115   :  { %v106_v50 = vpop.permute.xlu2 %105 }
 0x116   :  { %v110_v55 = vperm.slane %v106_v50, %v109_v53 }
 0x118   :  { %v112_v59 = vmul.f32 %v110_v55, %v253_v0 }
 0x11e   :  { %v127_v54 = vpop.permute.xlu2 %126 }
 0x11f   :  { %v131_v56 = vperm.slane %v127_v54, %v109_v53 }
 0x121   :  { %v133_v60 = vmul.f32 %v131_v56, %v260_v7 }
 0x131   :  { %v136_v57 = vpop.permute.xlu1 %135  ;;  %v116_v58 = vpop.permute.xlu0 %115 }
 0x132   :  { %v140_v61 = vperm.slane %v136_v57, %v109_v53  ;;  %v120_v62 = vperm.slane %v116_v58, %v109_v53 }
 0x134   :  { %v142_v63 = vadd.f32 %v140_v61, %v133_v60  ;;  %v122_v1 = vadd.f32 %v120_v62, %v112_v59 }
 0x136   :  { %143 = vst [vmem:[#allocation5 + $0x8] sm:$0xff] %v142_v63 }
 0x137   :  { %123 = vst [vmem:[#allocation5] sm:$0xff] %v122_v1 }
 0x138   :  { %154 = dma.vmem_to_hbm [thread:$0]  %s150_s2, 256, %s152_s22, [#allocation4]  }
 0x139   :  { %223 = dma.done.wait [#allocation4], 256  }
 0x13a   :  { %224 = vsyncadd [#allocation4], 4294967040 }
 0x13b   :  { %159 = vsyncpa [#allocation3], 1 }
 0x13c   :  { %160 = vsyncpa [#allocation4], 1 }

</bundles_post_ra>
